<compile_context>
chip_gen: v7x
topology: tpu7x:2x2x1
jax: 0.10.0
libtpu: 0.0.40
codegen_flags: <defaults>
</compile_context>

<pallas_src>
import functools
import math

import jax
import jax.numpy as jnp
from jax.experimental import pallas as pl
from jax.experimental.pallas import tpu as pltpu

_LANES = 128
_SUBLANES = 8


def _lambertw0(y, iters=3, recip=lambda x: 1.0 / x):
    """Principal-branch Lambert W for y >= -1/e, elementwise f32.

    Piecewise initial guess + `iters` Halley iterations (cubic convergence,
    one divide per iteration).
    """
    e = jnp.float32(math.e)
    y = y.astype(jnp.float32)

    # --- initial guess -------------------------------------------------------
    # near the branch point (y in [-1/e, -0.25)): series in p = sqrt(2(e*y + 1))
    p = jnp.sqrt(jnp.maximum(2.0 * (e * y + 1.0), 0.0))
    w_branch = -1.0 + p * (1.0 + p * (-1.0 / 3.0 + (11.0 / 72.0) * p))
    # around zero (y in [-0.25, 0.5)): W(y) ~ y - y^2 + 1.5 y^3
    w_small = y * (1.0 + y * (-1.0 + 1.5 * y))
    # moderate (y in [0.5, e)): log1p(y)
    w_mid = jnp.log1p(jnp.maximum(y, 0.0))
    # large (y >= e): asymptotic  L1 - L2 + L2/L1
    yb = jnp.maximum(y, e)
    L1 = jnp.log(yb)
    L2 = jnp.log(L1)
    w_big = L1 - L2 + L2 * recip(jnp.maximum(L1, 1.0))
    w = jnp.where(
        y < -0.25, w_branch,
        jnp.where(y < 0.5, w_small, jnp.where(y < e, w_mid, w_big)))

    # --- Halley iterations, single divide per step ---------------------------
    #   f(w)   = w e^w - y
    #   w_new  = w - 2 f (w+1) / (2 e^w (w+1)^2 - (w+2) f)
    for _ in range(iters):
        ew = jnp.exp(w)
        f = w * ew - y
        wp1 = w + 1.0
        num = 2.0 * f * wp1
        den = 2.0 * ew * wp1 * wp1 - (w + 2.0) * f
        den = jnp.where(jnp.abs(den) < 1e-30, 1e-30, den)
        w_new = w - num * recip(den)
        # already converged (also covers the exact branch point, wp1 ~ 0)
        w = jnp.where(jnp.abs(f) < 1e-10, w, w_new)
    return w


def _superloss_kernel(logits_ref, targets_ref, out_ref, acc_ref, *,
                      tau, inv_lam, lam, inv_bs, neg_2_over_e,
                      total, tile_rows, blocks_per_shard, iters):
    s = pl.program_id(0)
    i = pl.program_id(1)

    @pl.when(i == 0)
    def _():
        acc_ref[...] = jnp.zeros_like(acc_ref)

    x = logits_ref[...].astype(jnp.float32)
    t = targets_ref[...].astype(jnp.float32)
    diff = x - t
    l_i = diff * diff                                   # mse_loss(..., 'none')

    y = 0.5 * jnp.maximum(jnp.float32(neg_2_over_e), (l_i - tau) * inv_lam)
    w = _lambertw0(y, iters=iters,
                   recip=lambda v: pl.reciprocal(v, approx=True))
    sigma = jnp.exp(-w)                                 # exp(-W(y))
    # log(sigma) == -W(y)  ->  lam * log(sigma)^2 == lam * w^2
    loss = (l_i - tau) * sigma + lam * (w * w)

    # mask out the zero-padding of the lane-dense layout
    row_block = s * blocks_per_shard + i
    rows = jax.lax.broadcasted_iota(jnp.int32, (tile_rows, _LANES), 0)
    lanes = jax.lax.broadcasted_iota(jnp.int32, (tile_rows, _LANES), 1)
    flat_idx = (row_block * tile_rows + rows) * _LANES + lanes
    loss = jnp.where(flat_idx < total, loss, 0.0)

    # pure-VPU partial accumulation; no cross-lane reduction in the hot loop
    acc_ref[...] += loss

    @pl.when(i == pl.num_programs(1) - 1)
    def _():
        out_ref[...] = acc_ref[...] * inv_bs            # lane-dense partials


def make_superloss(C=10, lam=1.0, batch_size=1, *,
                   tile_rows=512, num_shards=2, lambertw_iters=3):
    tau = float(math.log(C))
    lam = float(lam)
    inv_lam = 1.0 / lam
    inv_bs = 1.0 / float(batch_size)
    neg_2_over_e = -2.0 / math.e
    tile_rows = max(_SUBLANES, (int(tile_rows) // _SUBLANES) * _SUBLANES)

    def superloss(logits, targets):
        assert logits.shape == targets.shape
        total = int(logits.size)

        # bf16 inputs stay bf16 (halves HBM->VMEM DMA bytes); cast in-kernel.
        if logits.dtype == jnp.bfloat16 and targets.dtype == jnp.bfloat16:
            in_dtype = jnp.bfloat16
        else:
            in_dtype = jnp.float32

        # ---- lane-dense layout: flatten and pad to (rows_padded, 128) -------
        rows_valid = -(-total // _LANES)
        tr = min(tile_rows, max(_SUBLANES, -(-rows_valid // _SUBLANES) * _SUBLANES))
        n_blocks = -(-rows_valid // tr)
        shards = max(1, min(int(num_shards), n_blocks))
        blocks_per_shard = -(-n_blocks // shards)
        rows_padded = shards * blocks_per_shard * tr
        padded = rows_padded * _LANES

        def _prep(a):
            a = a.astype(in_dtype).reshape(-1)
            a = jnp.pad(a, (0, padded - total))
            return a.reshape(rows_padded, _LANES)

        a = _prep(logits)
        b = _prep(targets)

        kernel = functools.partial(
            _superloss_kernel,
            tau=tau, inv_lam=inv_lam, lam=lam, inv_bs=inv_bs,
            neg_2_over_e=neg_2_over_e, total=total, tile_rows=tr,
            blocks_per_shard=blocks_per_shard, iters=int(lambertw_iters))

        cost = pl.CostEstimate(
            flops=int(padded * 60),
            transcendentals=int(padded * (2 * lambertw_iters + 5)),
            bytes_accessed=int(2 * padded * jnp.dtype(in_dtype).itemsize
                               + shards * tr * _LANES * 4),
        )

        partials = pl.pallas_call(
            kernel,
            out_shape=jax.ShapeDtypeStruct((shards * tr, _LANES), jnp.float32),
            grid_spec=pltpu.PrefetchScalarGridSpec(
                num_scalar_prefetch=0,
                grid=(shards, blocks_per_shard),
                in_specs=[
                    pl.BlockSpec((tr, _LANES),
                                 lambda s, i: (s * blocks_per_shard + i, 0)),
                    pl.BlockSpec((tr, _LANES),
                                 lambda s, i: (s * blocks_per_shard + i, 0)),
                ],
                out_specs=pl.BlockSpec((tr, _LANES), lambda s, i: (s, 0)),
                scratch_shapes=[pltpu.VMEM((tr, _LANES), jnp.float32)],
            ),
            compiler_params=pltpu.CompilerParams(
                dimension_semantics=("parallel", "arbitrary"),
                vmem_limit_bytes=32 * 1024 * 1024,
            ),
            cost_estimate=cost,
        )(a, b)

        # single cross-lane reduction, outside the hot loop
        return jnp.sum(partials)

    return superloss


def _superloss_ref(logits, targets, C=10, lam=1.0, batch_size=1):
    """Pure-JAX reference (same Lambert-W) for a sanity check."""
    tau = math.log(C)
    logits = logits.astype(jnp.float32)
    targets = targets.astype(jnp.float32)
    l_i = (logits - targets) ** 2
    y = 0.5 * jnp.maximum(-2.0 / math.e, (l_i - tau) / lam)
    w = _lambertw0(y)
    sigma = jnp.exp(-w)
    loss = (l_i - tau) * sigma + lam * (-w) ** 2
    return jnp.sum(loss) / batch_size


if __name__ == "__main__":
    key = jax.random.PRNGKey(0)
    k1, k2, k3, k4 = jax.random.split(key, 4)

    # Small regression-style batch of predictions (ThermoGNN predicts ddG scalars).
    N, D = 8, 16
    BATCH = 8
    logits = jax.random.normal(k1, (N, D), dtype=jnp.float32) * 2.0
    targets = jax.random.normal(k2, (N, D), dtype=jnp.float32) * 2.0

    superloss = make_superloss(C=10, lam=1.0, batch_size=BATCH)
    out = jax.block_until_ready(superloss(logits, targets))
    ref = jax.block_until_ready(
        _superloss_ref(logits, targets, C=10, lam=1.0, batch_size=BATCH))
    assert jnp.isfinite(out), "kernel produced non-finite loss"
    assert abs(float(out) - float(ref)) < 1e-3 * (1.0 + abs(float(ref))), (
        float(out), float(ref))

    # Second check: ragged size exercises the padding mask, multi-block grid
    # and the 2-shard ("parallel") path.
    N2, D2 = 300, 37
    logits2 = jax.random.normal(k3, (N2, D2), dtype=jnp.float32) * 3.0
    targets2 = jax.random.normal(k4, (N2, D2), dtype=jnp.float32)
    superloss2 = make_superloss(C=10, lam=1.0, batch_size=N2, tile_rows=32)
    out2 = jax.block_until_ready(superloss2(logits2, targets2))
    ref2 = jax.block_until_ready(
        _superloss_ref(logits2, targets2, C=10, lam=1.0, batch_size=N2))
    assert jnp.isfinite(out2), "kernel produced non-finite loss (case 2)"
    assert abs(float(out2) - float(ref2)) < 1e-3 * (1.0 + abs(float(ref2))), (
        float(out2), float(ref2))

    print("KERNEL_OK")
</pallas_src>

<mosaic_0001>
module attributes {stable_mosaic.version = 11 : i64} {
  func.func @_superloss_kernel(%arg0: i32, %arg1: i32, %arg2: memref<8x128xf32, #tpu.memory_space<vmem>>, %arg3: memref<8x128xf32, #tpu.memory_space<vmem>>, %arg4: memref<8x128xf32, #tpu.memory_space<vmem>>, %arg5: memref<8x128xf32, #tpu.memory_space<vmem>>) attributes {dimension_semantics = [#tpu.dimension_semantics<parallel>, #tpu.dimension_semantics<arbitrary>], iteration_bounds = array<i64: 1, 1>, scalar_prefetch = 0 : i64, scratch_operands = 1 : i64, tpu.core_type = #tpu.core_type<tc>, window_params = [{transform_indices = @transform_0, window_bounds = array<i64: 8, 128>}, {transform_indices = @transform_1, window_bounds = array<i64: 8, 128>}, {transform_indices = @transform_2, window_bounds = array<i64: 8, 128>}]} {
    %c0_i32 = arith.constant 0 : i32
    %0 = arith.cmpi eq, %arg1, %c0_i32 : i32
    %1 = arith.extui %0 : i1 to i32
    %c0_i32_0 = arith.constant 0 : i32
    %2 = arith.cmpi ne, %1, %c0_i32_0 : i32
    scf.if %2 {
      %cst_56 = arith.constant 0.000000e+00 : f32
      %178 = vector.broadcast %cst_56 : f32 to vector<8x128xf32>
      %c0_57 = arith.constant 0 : index
      %c0_58 = arith.constant 0 : index
      %179 = vector.load %arg5[%c0_57, %c0_58] : memref<8x128xf32, #tpu.memory_space<vmem>>, vector<8x128xf32>
      tpu.vector_store %arg5[%c0_57, %c0_58], %178 {strides = array<i32>} : memref<8x128xf32, #tpu.memory_space<vmem>>, vector<8x128xf32>,
    } else {
    }
    %c0 = arith.constant 0 : index
    %c0_1 = arith.constant 0 : index
    %3 = vector.load %arg2[%c0, %c0_1] : memref<8x128xf32, #tpu.memory_space<vmem>>, vector<8x128xf32>
    %c0_2 = arith.constant 0 : index
    %c0_3 = arith.constant 0 : index
    %4 = vector.load %arg3[%c0_2, %c0_3] : memref<8x128xf32, #tpu.memory_space<vmem>>, vector<8x128xf32>
    %5 = arith.subf %3, %4 : vector<8x128xf32>
    %6 = arith.mulf %5, %5 : vector<8x128xf32>
    %cst = arith.constant 2.30258512 : f32
    %7 = vector.broadcast %cst : f32 to vector<8x128xf32>
    %8 = arith.subf %6, %7 : vector<8x128xf32>
    %cst_4 = arith.constant 1.000000e+00 : f32
    %9 = vector.broadcast %cst_4 : f32 to vector<8x128xf32>
    %10 = arith.mulf %8, %9 : vector<8x128xf32>
    %cst_5 = arith.constant -0.735758901 : f32
    %11 = vector.broadcast %cst_5 : f32 to vector<8x128xf32>
    %12 = arith.maximumf %11, %10 : vector<8x128xf32>
    %cst_6 = arith.constant 5.000000e-01 : f32
    %13 = vector.broadcast %cst_6 : f32 to vector<8x128xf32>
    %14 = arith.mulf %13, %12 : vector<8x128xf32>
    %cst_7 = arith.constant 2.71828175 : f32
    %15 = vector.broadcast %cst_7 : f32 to vector<8x128xf32>
    %16 = arith.mulf %15, %14 : vector<8x128xf32>
    %cst_8 = arith.constant 1.000000e+00 : f32
    %17 = vector.broadcast %cst_8 : f32 to vector<8x128xf32>
    %18 = arith.addf %16, %17 : vector<8x128xf32>
    %cst_9 = arith.constant 2.000000e+00 : f32
    %19 = vector.broadcast %cst_9 : f32 to vector<8x128xf32>
    %20 = arith.mulf %19, %18 : vector<8x128xf32>
    %cst_10 = arith.constant 0.000000e+00 : f32
    %21 = vector.broadcast %cst_10 : f32 to vector<8x128xf32>
    %22 = arith.maximumf %20, %21 : vector<8x128xf32>
    %23 = math.sqrt %22 : vector<8x128xf32>
    %cst_11 = arith.constant 0.152777776 : f32
    %24 = vector.broadcast %cst_11 : f32 to vector<8x128xf32>
    %25 = arith.mulf %24, %23 : vector<8x128xf32>
    %cst_12 = arith.constant -0.333333343 : f32
    %26 = vector.broadcast %cst_12 : f32 to vector<8x128xf32>
    %27 = arith.addf %26, %25 : vector<8x128xf32>
    %28 = arith.mulf %23, %27 : vector<8x128xf32>
    %cst_13 = arith.constant 1.000000e+00 : f32
    %29 = vector.broadcast %cst_13 : f32 to vector<8x128xf32>
    %30 = arith.addf %29, %28 : vector<8x128xf32>
    %31 = arith.mulf %23, %30 : vector<8x128xf32>
    %cst_14 = arith.constant -1.000000e+00 : f32
    %32 = vector.broadcast %cst_14 : f32 to vector<8x128xf32>
    %33 = arith.addf %32, %31 : vector<8x128xf32>
    %cst_15 = arith.constant 1.500000e+00 : f32
    %34 = vector.broadcast %cst_15 : f32 to vector<8x128xf32>
    %35 = arith.mulf %34, %14 : vector<8x128xf32>
    %cst_16 = arith.constant -1.000000e+00 : f32
    %36 = vector.broadcast %cst_16 : f32 to vector<8x128xf32>
    %37 = arith.addf %36, %35 : vector<8x128xf32>
    %38 = arith.mulf %14, %37 : vector<8x128xf32>
    %cst_17 = arith.constant 1.000000e+00 : f32
    %39 = vector.broadcast %cst_17 : f32 to vector<8x128xf32>
    %40 = arith.addf %39, %38 : vector<8x128xf32>
    %41 = arith.mulf %14, %40 : vector<8x128xf32>
    %cst_18 = arith.constant 0.000000e+00 : f32
    %42 = vector.broadcast %cst_18 : f32 to vector<8x128xf32>
    %43 = arith.maximumf %14, %42 : vector<8x128xf32>
    %44 = math.log1p %43 : vector<8x128xf32>
    %cst_19 = arith.constant 2.71828175 : f32
    %45 = vector.broadcast %cst_19 : f32 to vector<8x128xf32>
    %46 = arith.maximumf %14, %45 : vector<8x128xf32>
    %47 = math.log %46 : vector<8x128xf32>
    %48 = math.log %47 : vector<8x128xf32>
    %49 = arith.subf %47, %48 : vector<8x128xf32>
    %cst_20 = arith.constant 1.000000e+00 : f32
    %50 = vector.broadcast %cst_20 : f32 to vector<8x128xf32>
    %51 = arith.maximumf %47, %50 : vector<8x128xf32>
    %52 = tpu.reciprocal %51 {approx = true} : vector<8x128xf32> -> vector<8x128xf32>
    %53 = arith.mulf %48, %52 : vector<8x128xf32>
    %54 = arith.addf %49, %53 : vector<8x128xf32>
    %cst_21 = arith.constant -2.500000e-01 : f32
    %55 = vector.broadcast %cst_21 : f32 to vector<8x128xf32>
    %56 = arith.cmpf olt, %14, %55 : vector<8x128xf32>
    %cst_22 = arith.constant 5.000000e-01 : f32
    %57 = vector.broadcast %cst_22 : f32 to vector<8x128xf32>
    %58 = arith.cmpf olt, %14, %57 : vector<8x128xf32>
    %cst_23 = arith.constant 2.71828175 : f32
    %59 = vector.broadcast %cst_23 : f32 to vector<8x128xf32>
    %60 = arith.cmpf olt, %14, %59 : vector<8x128xf32>
    %61 = arith.select %60, %44, %54 : vector<8x128xi1>, vector<8x128xf32>
    %62 = arith.select %58, %41, %61 : vector<8x128xi1>, vector<8x128xf32>
    %63 = arith.select %56, %33, %62 : vector<8x128xi1>, vector<8x128xf32>
    %64 = math.exp %63 : vector<8x128xf32>
    %65 = arith.mulf %63, %64 : vector<8x128xf32>
    %66 = arith.subf %65, %14 : vector<8x128xf32>
    %cst_24 = arith.constant 1.000000e+00 : f32
    %67 = vector.broadcast %cst_24 : f32 to vector<8x128xf32>
    %68 = arith.addf %63, %67 : vector<8x128xf32>
    %cst_25 = arith.constant 2.000000e+00 : f32
    %69 = vector.broadcast %cst_25 : f32 to vector<8x128xf32>
    %70 = arith.mulf %69, %66 : vector<8x128xf32>
    %71 = arith.mulf %70, %68 : vector<8x128xf32>
    %cst_26 = arith.constant 2.000000e+00 : f32
    %72 = vector.broadcast %cst_26 : f32 to vector<8x128xf32>
    %73 = arith.mulf %72, %64 : vector<8x128xf32>
    %74 = arith.mulf %73, %68 : vector<8x128xf32>
    %75 = arith.mulf %74, %68 : vector<8x128xf32>
    %cst_27 = arith.constant 2.000000e+00 : f32
    %76 = vector.broadcast %cst_27 : f32 to vector<8x128xf32>
    %77 = arith.addf %63, %76 : vector<8x128xf32>
    %78 = arith.mulf %77, %66 : vector<8x128xf32>
    %79 = arith.subf %75, %78 : vector<8x128xf32>
    %80 = math.absf %79 : vector<8x128xf32>
    %cst_28 = arith.constant 1.000000e-30 : f32
    %81 = vector.broadcast %cst_28 : f32 to vector<8x128xf32>
    %82 = arith.cmpf olt, %80, %81 : vector<8x128xf32>
    %cst_29 = arith.constant 1.000000e-30 : f32
    %83 = vector.broadcast %cst_29 : f32 to vector<8x128xf32>
    %84 = arith.select %82, %83, %79 : vector<8x128xi1>, vector<8x128xf32>
    %85 = tpu.reciprocal %84 {approx = true} : vector<8x128xf32> -> vector<8x128xf32>
    %86 = arith.mulf %71, %85 : vector<8x128xf32>
    %87 = arith.subf %63, %86 : vector<8x128xf32>
    %88 = math.absf %66 : vector<8x128xf32>
    %cst_30 = arith.constant 1.000000e-10 : f32
    %89 = vector.broadcast %cst_30 : f32 to vector<8x128xf32>
    %90 = arith.cmpf olt, %88, %89 : vector<8x128xf32>
    %91 = arith.select %90, %63, %87 : vector<8x128xi1>, vector<8x128xf32>
    %92 = math.exp %91 : vector<8x128xf32>
    %93 = arith.mulf %91, %92 : vector<8x128xf32>
    %94 = arith.subf %93, %14 : vector<8x128xf32>
    %cst_31 = arith.constant 1.000000e+00 : f32
    %95 = vector.broadcast %cst_31 : f32 to vector<8x128xf32>
    %96 = arith.addf %91, %95 : vector<8x128xf32>
    %cst_32 = arith.constant 2.000000e+00 : f32
    %97 = vector.broadcast %cst_32 : f32 to vector<8x128xf32>
    %98 = arith.mulf %97, %94 : vector<8x128xf32>
    %99 = arith.mulf %98, %96 : vector<8x128xf32>
    %cst_33 = arith.constant 2.000000e+00 : f32
    %100 = vector.broadcast %cst_33 : f32 to vector<8x128xf32>
    %101 = arith.mulf %100, %92 : vector<8x128xf32>
    %102 = arith.mulf %101, %96 : vector<8x128xf32>
    %103 = arith.mulf %102, %96 : vector<8x128xf32>
    %cst_34 = arith.constant 2.000000e+00 : f32
    %104 = vector.broadcast %cst_34 : f32 to vector<8x128xf32>
    %105 = arith.addf %91, %104 : vector<8x128xf32>
    %106 = arith.mulf %105, %94 : vector<8x128xf32>
    %107 = arith.subf %103, %106 : vector<8x128xf32>
    %108 = math.absf %107 : vector<8x128xf32>
    %cst_35 = arith.constant 1.000000e-30 : f32
    %109 = vector.broadcast %cst_35 : f32 to vector<8x128xf32>
    %110 = arith.cmpf olt, %108, %109 : vector<8x128xf32>
    %cst_36 = arith.constant 1.000000e-30 : f32
    %111 = vector.broadcast %cst_36 : f32 to vector<8x128xf32>
    %112 = arith.select %110, %111, %107 : vector<8x128xi1>, vector<8x128xf32>
    %113 = tpu.reciprocal %112 {approx = true} : vector<8x128xf32> -> vector<8x128xf32>
    %114 = arith.mulf %99, %113 : vector<8x128xf32>
    %115 = arith.subf %91, %114 : vector<8x128xf32>
    %116 = math.absf %94 : vector<8x128xf32>
    %cst_37 = arith.constant 1.000000e-10 : f32
    %117 = vector.broadcast %cst_37 : f32 to vector<8x128xf32>
    %118 = arith.cmpf olt, %116, %117 : vector<8x128xf32>
    %119 = arith.select %118, %91, %115 : vector<8x128xi1>, vector<8x128xf32>
    %120 = math.exp %119 : vector<8x128xf32>
    %121 = arith.mulf %119, %120 : vector<8x128xf32>
    %122 = arith.subf %121, %14 : vector<8x128xf32>
    %cst_38 = arith.constant 1.000000e+00 : f32
    %123 = vector.broadcast %cst_38 : f32 to vector<8x128xf32>
    %124 = arith.addf %119, %123 : vector<8x128xf32>
    %cst_39 = arith.constant 2.000000e+00 : f32
    %125 = vector.broadcast %cst_39 : f32 to vector<8x128xf32>
    %126 = arith.mulf %125, %122 : vector<8x128xf32>
    %127 = arith.mulf %126, %124 : vector<8x128xf32>
    %cst_40 = arith.constant 2.000000e+00 : f32
    %128 = vector.broadcast %cst_40 : f32 to vector<8x128xf32>
    %129 = arith.mulf %128, %120 : vector<8x128xf32>
    %130 = arith.mulf %129, %124 : vector<8x128xf32>
    %131 = arith.mulf %130, %124 : vector<8x128xf32>
    %cst_41 = arith.constant 2.000000e+00 : f32
    %132 = vector.broadcast %cst_41 : f32 to vector<8x128xf32>
    %133 = arith.addf %119, %132 : vector<8x128xf32>
    %134 = arith.mulf %133, %122 : vector<8x128xf32>
    %135 = arith.subf %131, %134 : vector<8x128xf32>
    %136 = math.absf %135 : vector<8x128xf32>
    %cst_42 = arith.constant 1.000000e-30 : f32
    %137 = vector.broadcast %cst_42 : f32 to vector<8x128xf32>
    %138 = arith.cmpf olt, %136, %137 : vector<8x128xf32>
    %cst_43 = arith.constant 1.000000e-30 : f32
    %139 = vector.broadcast %cst_43 : f32 to vector<8x128xf32>
    %140 = arith.select %138, %139, %135 : vector<8x128xi1>, vector<8x128xf32>
    %141 = tpu.reciprocal %140 {approx = true} : vector<8x128xf32> -> vector<8x128xf32>
    %142 = arith.mulf %127, %141 : vector<8x128xf32>
    %143 = arith.subf %119, %142 : vector<8x128xf32>
    %144 = math.absf %122 : vector<8x128xf32>
    %cst_44 = arith.constant 1.000000e-10 : f32
    %145 = vector.broadcast %cst_44 : f32 to vector<8x128xf32>
    %146 = arith.cmpf olt, %144, %145 : vector<8x128xf32>
    %147 = arith.select %146, %119, %143 : vector<8x128xi1>, vector<8x128xf32>
    %cst_45 = arith.constant 0.000000e+00 : f32
    %148 = vector.broadcast %cst_45 : f32 to vector<8x128xf32>
    %149 = arith.subf %148, %147 : vector<8x128xf32>
    %150 = math.exp %149 : vector<8x128xf32>
    %cst_46 = arith.constant 2.30258512 : f32
    %151 = vector.broadcast %cst_46 : f32 to vector<8x128xf32>
    %152 = arith.subf %6, %151 : vector<8x128xf32>
    %153 = arith.mulf %152, %150 : vector<8x128xf32>
    %154 = arith.mulf %147, %147 : vector<8x128xf32>
    %cst_47 = arith.constant 1.000000e+00 : f32
    %155 = vector.broadcast %cst_47 : f32 to vector<8x128xf32>
    %156 = arith.mulf %155, %154 : vector<8x128xf32>
    %157 = arith.addf %153, %156 : vector<8x128xf32>
    %c1_i32 = arith.constant 1 : i32
    %158 = arith.muli %arg0, %c1_i32 : i32
    %159 = arith.addi %158, %arg1 : i32
    %160 = tpu.iota {dimensions = array<i32: 0>} : vector<8x128xi32>
    %161 = tpu.iota {dimensions = array<i32: 1>} : vector<8x128xi32>
    %c8_i32 = arith.constant 8 : i32
    %162 = arith.muli %159, %c8_i32 : i32
    %163 = vector.broadcast %162 : i32 to vector<8x128xi32>
    %164 = arith.addi %163, %160 : vector<8x128xi32>
    %c128_i32 = arith.constant 128 : i32
    %165 = vector.broadcast %c128_i32 : i32 to vector<8x128xi32>
    %166 = arith.muli %164, %165 : vector<8x128xi32>
    %167 = arith.addi %166, %161 : vector<8x128xi32>
    %c128_i32_48 = arith.constant 128 : i32
    %168 = vector.broadcast %c128_i32_48 : i32 to vector<8x128xi32>
    %169 = arith.cmpi slt, %167, %168 : vector<8x128xi32>
    %cst_49 = arith.constant 0.000000e+00 : f32
    %170 = vector.broadcast %cst_49 : f32 to vector<8x128xf32>
    %171 = arith.select %169, %157, %170 : vector<8x128xi1>, vector<8x128xf32>
    %c0_50 = arith.constant 0 : index
    %c0_51 = arith.constant 0 : index
    %172 = vector.load %arg5[%c0_50, %c0_51] : memref<8x128xf32, #tpu.memory_space<vmem>>, vector<8x128xf32>
    %173 = arith.addf %172, %171 : vector<8x128xf32>
    %c0_52 = arith.constant 0 : index
    %c0_53 = arith.constant 0 : index
    %174 = vector.load %arg5[%c0_52, %c0_53] : memref<8x128xf32, #tpu.memory_space<vmem>>, vector<8x128xf32>
    tpu.vector_store %arg5[%c0_52, %c0_53], %173 {strides = array<i32>} : memref<8x128xf32, #tpu.memory_space<vmem>>, vector<8x128xf32>,
    %c0_i32_54 = arith.constant 0 : i32
    %175 = arith.cmpi eq, %arg1, %c0_i32_54 : i32
    %176 = arith.extui %175 : i1 to i32
    %c0_i32_55 = arith.constant 0 : i32
    %177 = arith.cmpi ne, %176, %c0_i32_55 : i32
    scf.if %177 {
      %c0_56 = arith.constant 0 : index
      %c0_57 = arith.constant 0 : index
      %178 = vector.load %arg5[%c0_56, %c0_57] : memref<8x128xf32, #tpu.memory_space<vmem>>, vector<8x128xf32>
      %cst_58 = arith.constant 1.250000e-01 : f32
      %179 = vector.broadcast %cst_58 : f32 to vector<8x128xf32>
      %180 = arith.mulf %178, %179 : vector<8x128xf32>
      %c0_59 = arith.constant 0 : index
      %c0_60 = arith.constant 0 : index
      %181 = vector.load %arg4[%c0_59, %c0_60] : memref<8x128xf32, #tpu.memory_space<vmem>>, vector<8x128xf32>
      tpu.vector_store %arg4[%c0_59, %c0_60], %180 {strides = array<i32>} : memref<8x128xf32, #tpu.memory_space<vmem>>, vector<8x128xf32>,
    } else {
    }
    return
  }
  func.func @transform_0(%arg0: i32, %arg1: i32) -> (i32, i32) {
    %c1_i32 = arith.constant 1 : i32
    %0 = arith.muli %arg0, %c1_i32 : i32
    %1 = arith.addi %0, %arg1 : i32
    %c0_i32 = arith.constant 0 : i32
    %c0_i32_0 = arith.constant 0 : i32
    return %1, %c0_i32 : i32, i32
  }
  func.func @transform_1(%arg0: i32, %arg1: i32) -> (i32, i32) {
    %c1_i32 = arith.constant 1 : i32
    %0 = arith.muli %arg0, %c1_i32 : i32
    %1 = arith.addi %0, %arg1 : i32
    %c0_i32 = arith.constant 0 : i32
    %c0_i32_0 = arith.constant 0 : i32
    return %1, %c0_i32 : i32, i32
  }
  func.func @transform_2(%arg0: i32, %arg1: i32) -> (i32, i32) {
    %c0_i32 = arith.constant 0 : i32
    %c0_i32_0 = arith.constant 0 : i32
    return %arg0, %c0_i32 : i32, i32
  }
}

</mosaic_0001>

<bundles_post_ra>
// kernel: tpu_custom_call.1
= control target key start
LH: loop header
LB: loop body
LE: loop exit
PB: predicated region body
PF: predicated region fallthrough
CT: control target
= control target key end

     0   :  { %7 = vsyncpa [#allocation4], 0  ;;  %s385_s0 = inlined_call_operand.hbm [shape: f32[8,128], index: 0, kind: input, shape index: {}]   ;;  %s386_s1 = inlined_call_operand.hbm [shape: f32[8,128], index: 1, kind: input, shape index: {}]   ;;  %s387_s2 = inlined_call_operand.hbm [shape: f32[8,128], index: 2, kind: output, shape index: {}]  }
   0x1   :  { %8 = vsyncpa [#allocation7], 0 }
   0x2   :  { %9 = vsyncpa [#allocation5], 0  ;;  %s313_s9 = smov [#allocation3]   ;;  %s314_s11 = smov [#allocation6]  }
   0x3   :  { %s19_s10 = sshll.u32 %s313_s9, 4  ;;  %s32_s12 = sshll.u32 %s314_s11, 4  ;;  %s20_s10 = int_to_ptr.vmem [resolvable:$true] %s19_s10  ;;  %s33_s12 = int_to_ptr.vmem [resolvable:$true] %s32_s12 }
   0x4   :  { %s241_s15 = scalar_lea.hbm %s385_s0, 128 }
   0x5   :  { %p242_p0 = scmp.ne.s32.totalorder %s385_s0, %s241_s15  ;;  %p245_p1 = scmp.lt.u32.totalorder %s241_s15, %s385_s0 }
   0x7   :  { %p247_p2 = pnand %p245_p1, %p242_p0 }
   0x9   :  { %250 = shalt.err (!%p247_p2)
}
   0xa   :  { %s251_s20 = scalar_lea.vmem %s20_s10, 128  ;;  %p256_p4 = scmp.lt.s32.totalorder %s20_s10, %s20_s10 }
   0xb   :  { %p252_p3 = scmp.ne.s32.totalorder %s20_s10, %s251_s20  ;;  %p257_p5 = scmp.lt.s32.totalorder %s251_s20, %s251_s20 }
   0xd   :  { %p258_p6 = por %p257_p5, %p256_p4 }
   0xf   :  { %p259_p7 = pnand %p258_p6, %p252_p3 }
  0x11   :  { %262 = shalt.err (!%p259_p7)
}
  0x12   :  { %22 = dma.hbm_to_vmem [thread:$0]  %s385_s0, 128, %s20_s10, [#allocation4]  }
  0x13   :  { %s263_s25 = scalar_lea.hbm %s386_s1, 128 }
  0x14   :  { %p264_p8 = scmp.ne.s32.totalorder %s386_s1, %s263_s25  ;;  %p267_p9 = scmp.lt.u32.totalorder %s263_s25, %s386_s1 }
  0x16   :  { %p269_p10 = pnand %p267_p9, %p264_p8 }
  0x18   :  { %272 = shalt.err (!%p269_p10)
}
  0x19   :  { %s273_s30 = scalar_lea.vmem %s33_s12, 128  ;;  %p278_p12 = scmp.lt.s32.totalorder %s33_s12, %s33_s12 }
  0x1a   :  { %p274_p11 = scmp.ne.s32.totalorder %s33_s12, %s273_s30  ;;  %p279_p13 = scmp.lt.s32.totalorder %s273_s30, %s273_s30 }
  0x1c   :  { %p280_p0 = por %p279_p13, %p278_p12 }
  0x1e   :  { %p281_p1 = pnand %p280_p0, %p274_p11 }
  0x20   :  { %284 = shalt.err (!%p281_p1)
}
  0x21   :  { %35 = dma.hbm_to_vmem [thread:$0]  %s386_s1, 128, %s33_s12, [#allocation7]  }
  0x22   :  { %307 = dma.done.wait [#allocation4], 128  }
  0x23   :  { %308 = vsyncadd [#allocation4], 4294967168 }
  0x24   :  { %309 = dma.done.wait [#allocation7], 128  }
  0x25   :  { %310 = vsyncadd [#allocation7], 4294967168  ;;  %v49_v0 = vld [vmem:[#allocation3] sm:$0xff]  ;;  %v50_v1 = vld [vmem:[#allocation6] sm:$0xff]  ;;  %s315_s1 = smov [#allocation8]  }
  0x26   :  { %v51_v2 = vsub.f32 %v49_v0, %v50_v1  ;;  %s203_s4 = sshll.u32 %s315_s1, 4  ;;  %s204_s4 = int_to_ptr.vmem [resolvable:$true] %s203_s4 }
  0x27   :  { %s285_s5 = scalar_lea.vmem %s204_s4, 128  ;;  %p290_p3 = scmp.lt.s32.totalorder %s204_s4, %s204_s4 }
  0x28   :  { %v52_v3 = vmul.f32 %v51_v2, %v51_v2  ;;  %p286_p2 = scmp.ne.s32.totalorder %s204_s4, %s285_s5  ;;  %p291_p4 = scmp.lt.s32.totalorder %s285_s5, %s285_s5 }
  0x2a   :  { %v355_v4 = vadd.f32 -2.3025851, %v52_v3  ;;  %p292_p5 = por %p291_p4, %p290_p3 }
  0x2c   :  { %v54_v5 = vmax.f32 %v355_v4, -0.7357589  ;;  %p293_p6 = pnand %p292_p5, %p286_p2 }
  0x2e   :  { %v358_v6 = vmul.f32 0.5, %v54_v5 }
  0x30   :  { %v56_v7 = vmul.f32 2.7182817, %v358_v6  ;;  %v88_v8 = vmax.f32 %v358_v6, 2.7182817  ;;  %v78_v11 = vmax.f32 %v358_v6, 0.0  ;;  %v73_v15 = vmul.f32 1.5, %v358_v6 }
  0x31   :  { %vm100_vm3 = vcmp.lt.f32.partialorder %v358_v6, 2.7182817  ;;  %vm99_vm4 = vcmp.lt.f32.partialorder %v358_v6, 0.5  ;;  %vm98_vm5 = vcmp.lt.f32.partialorder %v358_v6, -0.25 }
  0x32   :  { %v57_v9 = vadd.f32 1.0, %v56_v7  ;;  %217 = vlog2.f32 %v88_v8  ;;  %v79_v13 = vadd.f32 1.0, %v78_v11  ;;  %v74_v18 = vadd.f32 -1.0, %v73_v15 }
  0x33   :  { %v82_v21 = vmul.f32 -0.5, %v78_v11  ;;  %v85_v29 = vand.u32 2147483647, %v78_v11 }
  0x34   :  { %v58_v10 = vmul.f32 2.0, %v57_v9  ;;  %v75_v25 = vmul.f32 %v74_v18, %v358_v6 }
  0x35   :  { %v83_v26 = vadd.f32 1.0, %v82_v21  ;;  %vm86_vm2 = vcmp.lt.f32.partialorder %v85_v29, 0.0004427343 }
  0x36   :  { %v59_v12 = vmax.f32 %v58_v10, 0.0  ;;  %v76_v32 = vadd.f32 1.0, %v75_v25 }
  0x37   :  { %v84_v34 = vmul.f32 %v83_v26, %v78_v11 }
  0x38   :  { %219 = vrsqrt.f32 %v59_v12  ;;  %vm62_vm0 = vcmp.eq.f32.partialorder %v59_v12, inf  ;;  %v65_v20 = vand.u32 2147483648, %v59_v12  ;;  %vm64_vm1 = vcmp.eq.f32.partialorder %v59_v12, 0.0 }
  0x39   :  { %221 = vlog2.f32 %v79_v13  ;;  %v77_v41 = vmul.f32 %v76_v32, %v358_v6 }
  0x3c   :  { %v218_v14 = vpop.eup %217 }
  0x3d   :  { %v90_v16 = vmul.f32 0.6931472, %v218_v14 }
  0x3f   :  { %223 = vlog2.f32 %v90_v16  ;;  %v94_v17 = vmax.f32 %v90_v16, 1.0 }
  0x41   :  { %225 = vrcp.f32 %v94_v17 }
  0x42   :  { %v220_v19 = vpop.eup %219 }
  0x43   :  { %v61_v22 = vmul.f32 %v220_v19, %v59_v12  ;;  %v222_v27 = vpop.eup %221 }
  0x44   :  { %v81_v33 = vmul.f32 0.6931472, %v222_v27 }
  0x45   :  { %v63_v23 = vsel %vm62_vm0, %v59_v12, %v61_v22 }
  0x46   :  { %v66_v24 = vsel %vm64_vm1, %v65_v20, %v63_v23  ;;  %v87_v42 = vsel %vm86_vm2, %v84_v34, %v81_v33 }
  0x47   :  { %v67_v28 = vmul.f32 0.15277778, %v66_v24 }
  0x49   :  { %v68_v30 = vadd.f32 -0.33333334, %v67_v28  ;;  %v224_v31 = vpop.eup %223 }
  0x4a   :  { %v92_v36 = vmul.f32 0.6931472, %v224_v31 }
  0x4b   :  { %v69_v35 = vmul.f32 %v68_v30, %v66_v24  ;;  %v226_v37 = vpop.eup %225 }
  0x4c   :  { %v93_v39 = vsub.f32 %v90_v16, %v92_v36  ;;  %v96_v40 = vmul.f32 %v226_v37, %v92_v36 }
  0x4d   :  { %v70_v38 = vadd.f32 1.0, %v69_v35 }
  0x4e   :  { %v97_v44 = vadd.f32 %v96_v40, %v93_v39 }
  0x4f   :  { %v71_v43 = vmul.f32 %v70_v38, %v66_v24 }
  0x50   :  { %v101_v46 = vsel %vm100_vm3, %v87_v42, %v97_v44 }
  0x51   :  { %v72_v45 = vadd.f32 -1.0, %v71_v43  ;;  %v102_v47 = vsel %vm99_vm4, %v77_v41, %v101_v46 }
  0x53   :  { %v103_v48 = vsel %vm98_vm5, %v72_v45, %v102_v47 }
  0x54   :  { %v104_v49 = vmul.f32 1.442695, %v103_v48  ;;  %v108_v50 = vadd.f32 1.0, %v103_v48  ;;  %v114_v54 = vadd.f32 2.0, %v103_v48 }
  0x56   :  { %227 = vpow2.f32 %v104_v49 }
  0x60   :  { %v228_v51 = vpop.eup %227 }
  0x61   :  { %v106_v52 = vmul.f32 %v228_v51, %v103_v48  ;;  %v111_v53 = vmul.f32 2.0, %v228_v51 }
  0x63   :  { %v107_v55 = vsub.f32 %v106_v52, %v358_v6  ;;  %v112_v56 = vmul.f32 %v111_v53, %v108_v50 }
  0x65   :  { %v113_v57 = vmul.f32 %v112_v56, %v108_v50  ;;  %v115_v58 = vmul.f32 %v114_v54, %v107_v55  ;;  %v109_v62 = vmul.f32 2.0, %v107_v55  ;;  %v123_v0 = vand.u32 2147483647, %v107_v55 }
  0x67   :  { %v116_v59 = vsub.f32 %v113_v57, %v115_v58  ;;  %v110_v63 = vmul.f32 %v109_v62, %v108_v50  ;;  %vm124_vm7 = vcmp.lt.f32.partialorder %v123_v0, 1e-10 }
  0x69   :  { %v117_v60 = vand.u32 2147483647, %v116_v59 }
  0x6b   :  { %vm118_vm6 = vcmp.lt.f32.partialorder %v117_v60, 1e-30 }
  0x6c   :  { %v119_v61 = vsel %vm118_vm6, 1e-30, %v116_v59 }
  0x6d   :  { %229 = vrcp.f32 %v119_v61 }
  0x77   :  { %v230_v1 = vpop.eup %229 }
  0x78   :  { %v121_v2 = vmul.f32 %v230_v1, %v110_v63 }
  0x7a   :  { %v122_v3 = vsub.f32 %v103_v48, %v121_v2 }
  0x7c   :  { %v125_v5 = vsel %vm124_vm7, %v103_v48, %v122_v3  ;;  %v177_v48 = vlaneseq }
  0x7d   :  { %v126_v7 = vmul.f32 1.442695, %v125_v5  ;;  %v130_v8 = vadd.f32 1.0, %v125_v5  ;;  %v136_v12 = vadd.f32 2.0, %v125_v5 }
  0x7e   :  { %v180_v50 = vand.u32 127, %v177_v48 }
  0x7f   :  { %231 = vpow2.f32 %v126_v7 }
  0x89   :  { %v232_v9 = vpop.eup %231 }
  0x8a   :  { %v128_v10 = vmul.f32 %v232_v9, %v125_v5  ;;  %v133_v11 = vmul.f32 2.0, %v232_v9 }
  0x8c   :  { %v129_v13 = vsub.f32 %v128_v10, %v358_v6  ;;  %v134_v14 = vmul.f32 %v133_v11, %v130_v8 }
  0x8e   :  { %v135_v15 = vmul.f32 %v134_v14, %v130_v8  ;;  %v137_v16 = vmul.f32 %v136_v12, %v129_v13  ;;  %v131_v20 = vmul.f32 2.0, %v129_v13  ;;  %v145_v22 = vand.u32 2147483647, %v129_v13 }
  0x90   :  { %v138_v17 = vsub.f32 %v135_v15, %v137_v16  ;;  %v132_v21 = vmul.f32 %v131_v20, %v130_v8  ;;  %vm146_vm9 = vcmp.lt.f32.partialorder %v145_v22, 1e-10 }
  0x92   :  { %v139_v18 = vand.u32 2147483647, %v138_v17 }
  0x94   :  { %vm140_vm8 = vcmp.lt.f32.partialorder %v139_v18, 1e-30 }
  0x95   :  { %v141_v19 = vsel %vm140_vm8, 1e-30, %v138_v17 }
  0x96   :  { %233 = vrcp.f32 %v141_v19 }
  0xa0   :  { %v234_v23 = vpop.eup %233 }
  0xa1   :  { %v143_v24 = vmul.f32 %v234_v23, %v132_v21 }
  0xa3   :  { %v144_v25 = vsub.f32 %v125_v5, %v143_v24 }
  0xa5   :  { %v147_v26 = vsel %vm146_vm9, %v125_v5, %v144_v25 }
  0xa6   :  { %v148_v27 = vmul.f32 1.442695, %v147_v26  ;;  %v152_v28 = vadd.f32 1.0, %v147_v26  ;;  %v158_v32 = vadd.f32 2.0, %v147_v26 }
  0xa8   :  { %235 = vpow2.f32 %v148_v27 }
  0xb2   :  { %v236_v29 = vpop.eup %235 }
  0xb3   :  { %v150_v30 = vmul.f32 %v236_v29, %v147_v26  ;;  %v155_v31 = vmul.f32 2.0, %v236_v29 }
  0xb5   :  { %v151_v33 = vsub.f32 %v150_v30, %v358_v6  ;;  %v156_v34 = vmul.f32 %v155_v31, %v152_v28  ;;  %v178_v6 = vshrl.u32 %v177_v48, 7 }
  0xb7   :  { %v157_v35 = vmul.f32 %v156_v34, %v152_v28  ;;  %v159_v36 = vmul.f32 %v158_v32, %v151_v33  ;;  %v153_v40 = vmul.f32 2.0, %v151_v33  ;;  %v167_v42 = vand.u32 2147483647, %v151_v33 }
  0xb8   :  { %v184_v51 = vmul.u32 128, %v178_v6 }
  0xb9   :  { %v160_v37 = vsub.f32 %v157_v35, %v159_v36  ;;  %v154_v41 = vmul.f32 %v153_v40, %v152_v28  ;;  %vm168_vm11 = vcmp.lt.f32.partialorder %v167_v42, 1e-10 }
  0xba   :  { %v185_v52 = vadd.s32 %v184_v51, %v180_v50 }
  0xbb   :  { %v161_v38 = vand.u32 2147483647, %v160_v37 }
  0xbc   :  { %vm186_vm12 = vcmp.lt.s32.totalorder %v185_v52, 128 }
  0xbd   :  { %vm162_vm10 = vcmp.lt.f32.partialorder %v161_v38, 1e-30 }
  0xbe   :  { %v163_v39 = vsel %vm162_vm10, 1e-30, %v160_v37 }
  0xbf   :  { %237 = vrcp.f32 %v163_v39 }
  0xc9   :  { %v238_v43 = vpop.eup %237 }
  0xca   :  { %v165_v44 = vmul.f32 %v238_v43, %v154_v41 }
  0xcc   :  { %v166_v45 = vsub.f32 %v147_v26, %v165_v44 }
  0xce   :  { %v169_v46 = vsel %vm168_vm11, %v147_v26, %v166_v45 }
  0xcf   :  { %v170_v47 = vsub.f32 0.0, %v169_v46  ;;  %v174_v53 = vmul.f32 %v169_v46, %v169_v46 }
  0xd1   :  { %v171_v49 = vmul.f32 1.442695, %v170_v47 }
  0xd3   :  { %239 = vpow2.f32 %v171_v49 }
  0xdd   :  { %v240_v54 = vpop.eup %239 }
  0xde   :  { %v173_v55 = vmul.f32 %v240_v54, %v355_v4 }
  0xe0   :  { %v175_v56 = vadd.f32 %v174_v53, %v173_v55 }
  0xe2   :  { %v187_v57 = vsel %vm186_vm12, %v175_v56, 0.0 }
  0xe3   :  { %v195_v58 = vmul.f32 0.125, %v187_v57 }
  0xe5   :  { %196 = vst [vmem:[#allocation8] sm:$0xff] %v195_v58 }
  0xe6   :  { %296 = shalt.err (!%p293_p6)
}
  0xe7   :  { %s297_s8 = scalar_lea.hbm %s387_s2, 128 }
  0xe8   :  { %p298_p7 = scmp.ne.s32.totalorder %s387_s2, %s297_s8  ;;  %p301_p8 = scmp.lt.u32.totalorder %s297_s8, %s387_s2 }
  0xea   :  { %p303_p9 = pnand %p301_p8, %p298_p7 }
  0xec   :  { %306 = shalt.err (!%p303_p9)
}
  0xed   :  { %206 = dma.vmem_to_hbm [thread:$0]  %s204_s4, 128, %s387_s2, [#allocation5]  }
  0xee   :  { %311 = dma.done.wait [#allocation5], 128  }
  0xef   :  { %312 = vsyncadd [#allocation5], 4294967168 }
  0xf0   :  { %210 = vsyncpa [#allocation4], 1 }
  0xf1   :  { %211 = vsyncpa [#allocation7], 1 }
  0xf2   :  { %212 = vsyncpa [#allocation5], 1 }

</bundles_post_ra>
